<compile_context>
chip_gen: v7x
topology: tpu7x:2x2x1
jax: 0.10.0
libtpu: 0.0.40
codegen_flags: <defaults>
</compile_context>

<pallas_src>
import jax
import jax.numpy as jnp
from jax import lax
from jax.experimental import pallas as pl
from jax.experimental.pallas import tpu as pltpu


def _round_up(x: int, m: int) -> int:
    return ((x + m - 1) // m) * m


_VMEM_BUDGET = 40 << 20      # tiling budget; conservative for v7x (64 MiB physical)
_VMEM_LIMIT_CAP = 48 << 20   # never request more than this from Mosaic


def _gram_kernel(a_ref, b_ref, o_ref):
    # a_ref: (tm, D) rows i of h ; b_ref: (tn, D) rows j of h (same array).
    # out[i, j] = sum_k a[i, k] * b[j, k]  ==  (h @ h.T) tile.  K kept whole.
    o_ref[...] = lax.dot_general(
        a_ref[...], b_ref[...],
        dimension_numbers=(((1,), (1,)), ((), ())),
        preferred_element_type=jnp.float32,
    ).astype(o_ref.dtype)


def _gram_kernel_ksplit(a_ref, b_ref, o_ref, acc_ref):
    # Same as above but with the contraction split over grid axis 2.
    @pl.when(pl.program_id(2) == 0)
    def _():
        acc_ref[...] = jnp.zeros_like(acc_ref)

    acc_ref[...] += lax.dot_general(
        a_ref[...], b_ref[...],
        dimension_numbers=(((1,), (1,)), ((), ())),
        preferred_element_type=jnp.float32,
    )

    @pl.when(pl.program_id(2) == pl.num_programs(2) - 1)
    def _():
        o_ref[...] = acc_ref[...].astype(o_ref.dtype)


def reconstruct(h: jax.Array, *, tile: int = 1024) -> jax.Array:
    """Pallas equivalent of Reconstruct.forward: h @ h.T."""
    assert h.ndim == 2, "h must be 2-D [N, D]"
    N, D = h.shape
    itemsize = jnp.dtype(h.dtype).itemsize

    Np128 = _round_up(max(N, 1), 128)
    Dl = _round_up(max(D, 1), 128)  # lane-padded K footprint inside VMEM

    # ---- output tile selection (tm == tn, square output) ----
    tm = min(max(tile, 128), Np128)
    # Megacore (v7x): make sure the leading "parallel" axis has >= 2 blocks.
    if Np128 >= 256 and tm >= N:
        tm = _round_up(Np128 // 2, 128)
    if tm > N:
        tm = N  # single whole-dim block (block dim == array dim is always legal)

    def fits_whole(t):  # double-buffered lhs, rhs, out
        return 2 * (2 * t * Dl + t * t) * itemsize <= _VMEM_BUDGET

    def fits_split(t, dk):  # + single-buffered f32 accumulator
        return 2 * (2 * t * dk + t * t) * itemsize + t * t * 4 <= _VMEM_BUDGET

    dk = None  # None => whole-K path (no accumulator, no D padding)
    while not fits_whole(tm):
        for cand in (4096, 2048, 1024, 512, 256, 128):
            if cand < Dl and fits_split(tm, cand):
                dk = cand
                break
        if dk is not None or tm <= 128:
            break
        tm = max(128, _round_up(tm // 2, 128))

    grid_rows = pl.cdiv(N, tm)
    grid_cols = grid_rows

    cost = pl.CostEstimate(
        flops=2 * N * N * D,
        # lhs read once, rhs re-streamed once per grid row, output written once
        bytes_accessed=itemsize * (N * N + N * D + grid_rows * N * D),
        transcendentals=0,
    )

    if dk is None:
        # ---- whole-K path (common case) ----
        vmem_needed = 2 * (2 * tm * Dl + tm * tm) * itemsize
        vmem_limit = int(min(vmem_needed * 3 // 2 + (2 << 20), _VMEM_LIMIT_CAP))
        return pl.pallas_call(
            _gram_kernel,
            out_shape=jax.ShapeDtypeStruct((N, N), h.dtype),
            grid_spec=pltpu.PrefetchScalarGridSpec(
                num_scalar_prefetch=0,
                grid=(grid_rows, grid_cols),
                in_specs=[
                    pl.BlockSpec((tm, D), lambda i, j: (i, 0)),  # rows i of h
                    pl.BlockSpec((tm, D), lambda i, j: (j, 0)),  # rows j of h
                ],
                out_specs=pl.BlockSpec((tm, tm), lambda i, j: (i, j)),
            ),
            compiler_params=pltpu.CompilerParams(
                dimension_semantics=("parallel", "parallel"),
                vmem_limit_bytes=vmem_limit,
            ),
            cost_estimate=cost,
        )(h, h)

    # ---- K-split path (very large D): pad D with zeros to a multiple of dk (exact). ----
    Dp = _round_up(D, dk)
    hp = jnp.pad(h, ((0, 0), (0, Dp - D))) if Dp != D else h
    vmem_needed = 2 * (2 * tm * dk + tm * tm) * itemsize + tm * tm * 4
    vmem_limit = int(min(vmem_needed * 3 // 2 + (2 << 20), _VMEM_LIMIT_CAP))
    return pl.pallas_call(
        _gram_kernel_ksplit,
        out_shape=jax.ShapeDtypeStruct((N, N), h.dtype),
        grid_spec=pltpu.PrefetchScalarGridSpec(
            num_scalar_prefetch=0,
            grid=(grid_rows, grid_cols, Dp // dk),
            in_specs=[
                pl.BlockSpec((tm, dk), lambda i, j, k: (i, k)),
                pl.BlockSpec((tm, dk), lambda i, j, k: (j, k)),
            ],
            out_specs=pl.BlockSpec((tm, tm), lambda i, j, k: (i, j)),
            scratch_shapes=[pltpu.VMEM((tm, tm), jnp.float32)],
        ),
        compiler_params=pltpu.CompilerParams(
            dimension_semantics=("parallel", "parallel", "arbitrary"),
            vmem_limit_bytes=vmem_limit,
        ),
        cost_estimate=cost,
    )(hp, hp)


if __name__ == "__main__":
    key = jax.random.PRNGKey(0)

    # Case 1: 128-aligned small shape (256 nodes, 64-dim embeddings).
    N, D = 256, 64
    h = jax.random.normal(key, (N, D), dtype=jnp.float32)
    out = jax.block_until_ready(reconstruct(h))
    ref = h @ h.T
    assert out.shape == (N, N)
    assert jnp.allclose(out, ref, atol=1e-4, rtol=1e-4), "mismatch vs reference"

    # Case 2: non-128-multiple N / D exercises the ragged (masked) block path.
    key2 = jax.random.PRNGKey(1)
    N2, D2 = 300, 96
    h2 = jax.random.normal(key2, (N2, D2), dtype=jnp.float32)
    out2 = jax.block_until_ready(reconstruct(h2))
    ref2 = h2 @ h2.T
    assert out2.shape == (N2, N2)
    assert jnp.allclose(out2, ref2, atol=1e-4, rtol=1e-4), "mismatch vs reference (ragged)"

    print("KERNEL_OK")
</pallas_src>

<mosaic_0001>
module attributes {stable_mosaic.version = 11 : i64} {
  func.func @_gram_kernel(%arg0: i32, %arg1: i32, %arg2: memref<128x64xf32, #tpu.memory_space<vmem>>, %arg3: memref<128x64xf32, #tpu.memory_space<vmem>>, %arg4: memref<128x128xf32, #tpu.memory_space<vmem>>) attributes {dimension_semantics = [#tpu.dimension_semantics<parallel>, #tpu.dimension_semantics<parallel>], iteration_bounds = array<i64: 2, 2>, scalar_prefetch = 0 : i64, scratch_operands = 0 : i64, tpu.core_type = #tpu.core_type<tc>, window_params = [{transform_indices = @transform_0, window_bounds = array<i64: 128, 64>}, {transform_indices = @transform_1, window_bounds = array<i64: 128, 64>}, {transform_indices = @transform_2, window_bounds = array<i64: 128, 128>}]} {
    %c0 = arith.constant 0 : index
    %c0_0 = arith.constant 0 : index
    %0 = vector.load %arg2[%c0, %c0_0] : memref<128x64xf32, #tpu.memory_space<vmem>>, vector<128x64xf32>
    %c0_1 = arith.constant 0 : index
    %c0_2 = arith.constant 0 : index
    %1 = vector.load %arg3[%c0_1, %c0_2] : memref<128x64xf32, #tpu.memory_space<vmem>>, vector<128x64xf32>
    %cst = arith.constant dense<0.000000e+00> : vector<128x128xf32>
    %2 = tpu.matmul %0, %1, %cst {dimension_numbers = #tpu.dot_dimension_numbers<[1], [1], [0], [0], [0, 0, 1, 0], [], []>} : vector<128x64xf32>, vector<128x64xf32>, vector<128x128xf32> -> vector<128x128xf32>
    %c0_3 = arith.constant 0 : index
    %c0_4 = arith.constant 0 : index
    %3 = vector.load %arg4[%c0_3, %c0_4] : memref<128x128xf32, #tpu.memory_space<vmem>>, vector<128x128xf32>
    tpu.vector_store %arg4[%c0_3, %c0_4], %2 {strides = array<i32>} : memref<128x128xf32, #tpu.memory_space<vmem>>, vector<128x128xf32>,
    return
  }
  func.func @transform_0(%arg0: i32, %arg1: i32) -> (i32, i32) {
    %c0_i32 = arith.constant 0 : i32
    %c0_i32_0 = arith.constant 0 : i32
    return %arg0, %c0_i32 : i32, i32
  }
  func.func @transform_1(%arg0: i32, %arg1: i32) -> (i32, i32) {
    %c0_i32 = arith.constant 0 : i32
    %c0_i32_0 = arith.constant 0 : i32
    return %arg1, %c0_i32 : i32, i32
  }
  func.func @transform_2(%arg0: i32, %arg1: i32) -> (i32, i32) {
    %c0_i32 = arith.constant 0 : i32
    return %arg0, %arg1 : i32, i32
  }
}

</mosaic_0001>

<bundles_post_ra>
// kernel: tpu_custom_call.1
= control target key start
LH: loop header
LB: loop body
LE: loop exit
PB: predicated region body
PF: predicated region fallthrough
CT: control target
= control target key end

     0   :  { %7 = vsyncpa [#allocation3], 0  ;;  %s1250_s0 = inlined_call_operand.vmem [shape: f32[256,64], index: 0, kind: input, shape index: {}]   ;;  %s1251_s1 = inlined_call_operand.vmem [shape: f32[256,64], index: 1, kind: input, shape index: {}]   ;;  %s1252_s2 = inlined_call_operand.hbm [shape: f32[256,256], index: 2, kind: output, shape index: {}]  }
   0x1   :  { %9 = vsyncpa [#allocation3 + $0x1], 0  ;;  %s964_s9 = smov 0   ;;  %s966_s10 = smov 0  }
   0x2   :  { %s968_s11 = smov 0   ;;  %s970_s12 = smov 0  }
   0x3   :  { %s972_s13 = smov 0   ;;  %s974_s14 = smov 0  }
   0x4   :  { %s976_s15 = smov 0   ;;  %s978_s16 = smov 0  }
   0x5 LB: > { %s574_s17 = sadd.s32 4294967295, %s943_s16   ;;  %s575_s18 = sadd.s32 4294967294, %s943_s16   ;;  %s943_s16 = sphi %s978_s16, %s15_s16   ;;  %s939_s15 = sphi %s976_s15, %s1263_s15   ;;  %s935_s14 = sphi %s974_s14, %s1262_s14   ;;  %s931_s13 = sphi %s972_s13, %s1261_s13   ;;  %s927_s12 = sphi %s970_s12, %s1260_s12   ;;  %s923_s11 = sphi %s968_s11, %s1259_s11   ;;  %s919_s10 = sphi %s966_s10, %s1258_s10   ;;  %s915_s9 = sphi %s964_s9, %s1257_s9  }
   0x6   : > { %s24_s19 = sadd.s32 1, %s935_s14  ;;  %s27_s20 = sadd.s32 1, %s939_s15 }
   0x7   : > { %p25_p0 = scmp.ge.s32.totalorder %s24_s19, 2  ;;  %p98_p1 = scmp.ne.s32.totalorder %s923_s11, %s919_s10 }
   0x8   : > { %p99_p2 = scmp.eq.s32.totalorder %s574_s17, 3  ;;  %p104_p5 = scmp.ne.s32.totalorder %s919_s10, %s915_s9 }
   0x9   : > { %s1265_s19 = smov (%p25_p0, %s24_s19), 0  ;;  %s1267_s20 = smov (!%p25_p0, %s27_s20), %s939_s15 }
   0xa   : > { %s84_s21 = ssub.s32 %s935_s14, %s1265_s19  ;;  %p1015_p3 = por %p99_p2, %p98_p1 }
   0xb   : > { %p29_p4 = scmp.ge.s32.totalorder %s1267_s20, 2  ;;  %p105_p6 = scmp.eq.s32.totalorder %s575_s18, 3 }
   0xc   : > { %p578_p7 = scmp.ge.s32.totalorder %s943_s16, 1  ;;  %p141_p9 = scmp.lt.s32.totalorder %s943_s16, 5 }
   0xd   : > { %s1269_s20 = smov (%p29_p4, %s1267_s20), 0  ;;  %p1024_p8 = por %p105_p6, %p104_p5 }
   0xe   : > { %s83_s24 = ssub.s32 %s939_s15, %s1269_s20  ;;  %s88_s25 = sadd.s32 1, %s923_s11 }
   0xf   : > { %s85_s26 = sor.u32 %s84_s21, %s83_s24  ;;  %p142_p10 = pnand %p578_p7, %p141_p9 }
  0x10   : > { %p86_p11 = scmp.eq.s32.totalorder %s85_s26, 0  ;;  %s582_s28 = sshll.u32 (!%p142_p10), %s927_s12, 4  ;;  %vm213_vm0 = vcmask (!%p142_p10), 523264  }
  0x11   : > { %145 = sbr.rel (%p142_p10) target bundleno = 335 (0x14f), region = 28  ;;  %s580_s29 = sshll.u32 (!%p142_p10), %s931_s13, 4  ;;  %vm1044_vm1 = vmpackc.low (!%p142_p10), %vm213_vm0, %vm213_vm0 }
  0x12   : > { %s1033_s27 = scalar_select %p86_p11, %s923_s11, %s88_s25  }
  0x13   : > { %p175_p12 = scmp.lt.s32.totalorder (!%p142_p10), %s582_s28, 31  ;;  %p169_p13 = scmp.lt.s32.totalorder (!%p142_p10), %s580_s29, 31 }
  0x14   : > { %s165_s18 = sand.u32 (!%p142_p10), 1, %s919_s10   ;;  %s622_s25 = sshll.u32 (!%p142_p10), %s931_s13, 5 }
  0x15   : > { %s579_s21 = sshll.u32 (!%p142_p10), %s165_s18, 7  ;;  %s484_s26 = sadd.s32 (!%p142_p10), %s927_s12, %s622_s25 }
  0x16   : > { %s1168_s24 = scalar_lea.vmem (!%p142_p10), [#allocation2], %s579_s21  ;;  %s1198_s3 = scalar_lea.sflag (!%p142_p10), [#allocation3], %s165_s18 }
  0x17   : > { %s487_s13 = sshll.u32 (!%p142_p10), %s1168_s24, 4  ;;  %s1190_s13 = int_to_ptr.vmem [resolvable:$true] %s487_s13 }
  0x18   : > { %s1271_s28 = smov (!%p175_p12, %s582_s28), 31  ;;  %s1273_s29 = smov (!%p169_p13, %s580_s29), 31 }
  0x19   : > { %s583_s30 = sshll.u32 %s1271_s28, 3  ;;  %s581_s6 = sshll.u32 %s1273_s29, 3 }
  0x1a   : > { %s1040_s5 = scalar_lea.vmem %s1251_s1, %s583_s30  ;;  %s1055_s17 = scalar_lea.vmem %s1250_s0, %s581_s6 }
  0x1b   : > { %v197_v1 = vld [vmem:[%s1040_s5] sm:$0xff]  ;;  %v198_v2 = vld [vmem:[%s1040_s5 + $0x8] sm:$0xff]  ;;  %v199_v3 = vld [vmem:[%s1040_s5 + $0x10] sm:$0xff]  ;;  %s619_s28 = sshll.u32 %s484_s26, 7  ;;  %s849_s4 = scalar_lea.vmem %s1190_s13, 2048 }
  0x1c   : > { %v711_v4 = vpack.c.bf16 %v198_v2, %v197_v1  ;;  %v200_v5 = vld [vmem:[%s1040_s5 + $0x18] sm:$0xff]  ;;  %v181_v7 = vld [vmem:[%s1055_s17] sm:$0xff]  ;;  %v202_v10 = vld [vmem:[%s1040_s5 + $0x28] sm:$0xff]  ;;  %s1188_s30 = scalar_lea.hbm %s1252_s2, %s619_s28  ;;  %p850_p0 = scmp.ne.s32.totalorder %s1190_s13, %s849_s4 }
  0x1d   : > { %v717_v6 = vpack.c.bf16 %v200_v5, %v199_v3  ;;  %v189_v8 = vld [vmem:[%s1055_s17 + $0x40] sm:$0xff]  ;;  %687 = vmatprep.mubr.msk.f32.mxu0 %vm213_vm0, %v181_v7  ;;  %v203_v12 = vld [vmem:[%s1040_s5 + $0x30] sm:$0xff]  ;;  %v204_v13 = vld [vmem:[%s1040_s5 + $0x38] sm:$0xff] }
  0x1e   : > { %713 = vmatprep.subr.msk.bf16.mxu0 %vm1044_vm1, %v711_v4  ;;  %759 = vmatprep.subr.msk.bf16.mxu1 %vm1044_vm1, %v711_v4  ;;  %v201_v9 = vld [vmem:[%s1040_s5 + $0x20] sm:$0xff]  ;;  %v729_v14 = vpack.c.bf16 %v204_v13, %v203_v12  ;;  %v206_v16 = vld [vmem:[%s1040_s5 + $0x48] sm:$0xff]  ;;  %v207_v18 = vld [vmem:[%s1040_s5 + $0x50] sm:$0xff]  ;;  %p851_p1 = pnand %p850_p0, %p1015_p3 }
  0x1f   : > { %716 = vmatpush3.bf16.xpose.msk.msra.mxu0 %vm1044_vm1, %v711_v4  ;;  %767 = vmatpush3.bf16.xpose.msk.msra.mxu1 %vm1044_vm1, %v711_v4  ;;  %v723_v11 = vpack.c.bf16 %v202_v10, %v201_v9  ;;  %v205_v15 = vld [vmem:[%s1040_s5 + $0x40] sm:$0xff]  ;;  %v208_v19 = vld [vmem:[%s1040_s5 + $0x58] sm:$0xff]  ;;  %v210_v22 = vld [vmem:[%s1040_s5 + $0x68] sm:$0xff] }
  0x20   : > { %719 = vmatprep.subr.msk.bf16.mxu0 %vm1044_vm1, %v717_v6  ;;  %760 = vmatprep.subr.msk.bf16.mxu1 %vm1044_vm1, %v717_v6  ;;  %v735_v17 = vpack.c.bf16 %v206_v16, %v205_v15  ;;  %v741_v20 = vpack.c.bf16 %v208_v19, %v207_v18  ;;  %v209_v21 = vld [vmem:[%s1040_s5 + $0x60] sm:$0xff]  ;;  %v211_v24 = vld [vmem:[%s1040_s5 + $0x70] sm:$0xff]  ;;  %v212_v25 = vld [vmem:[%s1040_s5 + $0x78] sm:$0xff]  ;;  %p852_p2 = pneg %p851_p1  ;;  %s945_s5 = smov [#allocation2]  }
  0x21   : > { %699 = vmatprep.mubr.msk.f32.mxu1 %vm213_vm0, %v189_v8  ;;  %v747_v23 = vpack.c.bf16 %v210_v22, %v209_v21  ;;  %v753_v26 = vpack.c.bf16 %v212_v25, %v211_v24  ;;  %v182_v27 = vld [vmem:[%s1055_s17 + $0x8] sm:$0xff]  ;;  %v183_v29 = vld [vmem:[%s1055_s17 + $0x10] sm:$0xff]  ;;  %v184_v31 = vld [vmem:[%s1055_s17 + $0x18] sm:$0xff]  ;;  %s853_s6 = sshll.u32 %s945_s5, 4  ;;  %s854_s6 = int_to_ptr.vmem [resolvable:$false] %s853_s6 }
  0x22   : > { %v190_v28 = vld [vmem:[%s1055_s17 + $0x48] sm:$0xff]  ;;  %v191_v30 = vld [vmem:[%s1055_s17 + $0x50] sm:$0xff]  ;;  %v192_v32 = vld [vmem:[%s1055_s17 + $0x58] sm:$0xff]  ;;  %s855_s7 = scalar_lea.vmem %s854_s6, 4096  ;;  %p856_p4 = scmp.lt.s32.totalorder %s1190_s13, %s854_s6 }
  0x23   : > { %v185_v33 = vld [vmem:[%s1055_s17 + $0x20] sm:$0xff]  ;;  %v186_v35 = vld [vmem:[%s1055_s17 + $0x28] sm:$0xff]  ;;  %v187_v37 = vld [vmem:[%s1055_s17 + $0x30] sm:$0xff]  ;;  %p857_p5 = scmp.lt.s32.totalorder %s855_s7, %s849_s4 }
  0x24   : > { %v193_v34 = vld [vmem:[%s1055_s17 + $0x60] sm:$0xff]  ;;  %v194_v36 = vld [vmem:[%s1055_s17 + $0x68] sm:$0xff]  ;;  %v195_v38 = vld [vmem:[%s1055_s17 + $0x70] sm:$0xff] }
  0x25   : > { %v188_v39 = vld [vmem:[%s1055_s17 + $0x38] sm:$0xff]  ;;  %p858_p6 = por %p857_p5, %p856_p4 }
  0x26   : > { %v196_v40 = vld [vmem:[%s1055_s17 + $0x78] sm:$0xff] }
  0x27   : > { %722 = vmatpush3.bf16.xpose.msk.msra.mxu0 %vm1044_vm1, %v717_v6  ;;  %768 = vmatpush3.bf16.xpose.msk.msra.mxu1 %vm1044_vm1, %v717_v6  ;;  %p859_p7 = pnand %p858_p6, %p852_p2 }
  0x28   : > { %725 = vmatprep.subr.msk.bf16.mxu0 %vm1044_vm1, %v723_v11  ;;  %761 = vmatprep.subr.msk.bf16.mxu1 %vm1044_vm1, %v723_v11 }
  0x2f   : > { %728 = vmatpush3.bf16.xpose.msk.msra.mxu0 %vm1044_vm1, %v723_v11  ;;  %769 = vmatpush3.bf16.xpose.msk.msra.mxu1 %vm1044_vm1, %v723_v11 }
  0x30   : > { %731 = vmatprep.subr.msk.bf16.mxu0 %vm1044_vm1, %v729_v14  ;;  %762 = vmatprep.subr.msk.bf16.mxu1 %vm1044_vm1, %v729_v14 }
  0x37   : > { %734 = vmatpush3.bf16.xpose.msk.msra.mxu0 %vm1044_vm1, %v729_v14  ;;  %770 = vmatpush3.bf16.xpose.msk.msra.mxu1 %vm1044_vm1, %v729_v14 }
  0x38   : > { %737 = vmatprep.subr.msk.bf16.mxu0 %vm1044_vm1, %v735_v17  ;;  %763 = vmatprep.subr.msk.bf16.mxu1 %vm1044_vm1, %v735_v17 }
  0x3f   : > { %740 = vmatpush3.bf16.xpose.msk.msra.mxu0 %vm1044_vm1, %v735_v17  ;;  %771 = vmatpush3.bf16.xpose.msk.msra.mxu1 %vm1044_vm1, %v735_v17 }
  0x40   : > { %743 = vmatprep.subr.msk.bf16.mxu0 %vm1044_vm1, %v741_v20  ;;  %764 = vmatprep.subr.msk.bf16.mxu1 %vm1044_vm1, %v741_v20 }
  0x47   : > { %746 = vmatpush3.bf16.xpose.msk.msra.mxu0 %vm1044_vm1, %v741_v20  ;;  %772 = vmatpush3.bf16.xpose.msk.msra.mxu1 %vm1044_vm1, %v741_v20 }
  0x48   : > { %749 = vmatprep.subr.msk.bf16.mxu0 %vm1044_vm1, %v747_v23  ;;  %765 = vmatprep.subr.msk.bf16.mxu1 %vm1044_vm1, %v747_v23 }
  0x4f   : > { %752 = vmatpush3.bf16.xpose.msk.msra.mxu0 %vm1044_vm1, %v747_v23  ;;  %773 = vmatpush3.bf16.xpose.msk.msra.mxu1 %vm1044_vm1, %v747_v23 }
  0x50   : > { %755 = vmatprep.subr.msk.bf16.mxu0 %vm1044_vm1, %v753_v26  ;;  %766 = vmatprep.subr.msk.bf16.mxu1 %vm1044_vm1, %v753_v26 }
  0x57   : > { %758 = vmatpush3.bf16.xpose.msk.msra.mxu0 %vm1044_vm1, %v753_v26  ;;  %774 = vmatpush3.bf16.xpose.msk.msra.mxu1 %vm1044_vm1, %v753_v26 }
  0x5e   : > { %688 = vmatmul.mubr.msk.f32.vlgmr.msra.gmra.mrb[0].mxu0 %vm213_vm0, %v182_v27  ;;  %700 = vmatmul.mubr.msk.f32.vlgmr.msra.gmra.mrb[0].mxu1 %vm213_vm0, %v190_v28 }
  0x5f   : > { %690 = vmatprep.mubr.msk.f32.mxu0 %vm213_vm0, %v183_v29  ;;  %702 = vmatprep.mubr.msk.f32.mxu1 %vm213_vm0, %v191_v30 }
  0x62   : > { %691 = vmatmul.mubr.msk.f32.gmra.mrb[2].mxu0 %vm213_vm0, %v184_v31  ;;  %703 = vmatmul.mubr.msk.f32.gmra.mrb[2].mxu1 %vm213_vm0, %v192_v32 }
  0x63   : > { %693 = vmatprep.mubr.msk.f32.mxu0 %vm213_vm0, %v185_v33  ;;  %705 = vmatprep.mubr.msk.f32.mxu1 %vm213_vm0, %v193_v34 }
  0x66   : > { %694 = vmatmul.mubr.msk.f32.gmra.mrb[4].mxu0 %vm213_vm0, %v186_v35  ;;  %706 = vmatmul.mubr.msk.f32.gmra.mrb[4].mxu1 %vm213_vm0, %v194_v36 }
  0x67   : > { %696 = vmatprep.mubr.msk.f32.mxu0 %vm213_vm0, %v187_v37  ;;  %708 = vmatprep.mubr.msk.f32.mxu1 %vm213_vm0, %v195_v38 }
  0x6a   : > { %697 = vmatmul.mubr.msk.f32.gmra.mrb[6].mxu0 %vm213_vm0, %v188_v39  ;;  %709 = vmatmul.mubr.msk.f32.gmra.mrb[6].mxu1 %vm213_vm0, %v196_v40 }
 0x131   : > { %v689_v41 = vpop.f32.mrb[0].mxu0  ;;  %v701_v42 = vpop.f32.mrb[0].mxu1 }
 0x132   : > { %456 = vst [vmem:[%s1168_s24 + $0x8] sm:$0xff] %v689_v41  ;;  %464 = vst [vmem:[%s1168_s24 + $0x48] sm:$0xff] %v701_v42  ;;  %v376_v43 = vpop.f32.mrb[1].mxu0  ;;  %v416_v44 = vpop.f32.mrb[1].mxu1 }
 0x133   : > { %455 = vst [vmem:[%s1168_s24] sm:$0xff] %v376_v43  ;;  %463 = vst [vmem:[%s1168_s24 + $0x40] sm:$0xff] %v416_v44 }
 0x135   : > { %v692_v45 = vpop.f32.mrb[2].mxu0  ;;  %v704_v46 = vpop.f32.mrb[2].mxu1 }
 0x136   : > { %458 = vst [vmem:[%s1168_s24 + $0x18] sm:$0xff] %v692_v45  ;;  %466 = vst [vmem:[%s1168_s24 + $0x58] sm:$0xff] %v704_v46  ;;  %v386_v47 = vpop.f32.mrb[3].mxu0  ;;  %v426_v48 = vpop.f32.mrb[3].mxu1 }
 0x137   : > { %457 = vst [vmem:[%s1168_s24 + $0x10] sm:$0xff] %v386_v47  ;;  %465 = vst [vmem:[%s1168_s24 + $0x50] sm:$0xff] %v426_v48 }
 0x139   : > { %v695_v49 = vpop.f32.mrb[4].mxu0  ;;  %v707_v50 = vpop.f32.mrb[4].mxu1 }
 0x13a   : > { %460 = vst [vmem:[%s1168_s24 + $0x28] sm:$0xff] %v695_v49  ;;  %468 = vst [vmem:[%s1168_s24 + $0x68] sm:$0xff] %v707_v50  ;;  %v396_v51 = vpop.f32.mrb[5].mxu0  ;;  %v436_v52 = vpop.f32.mrb[5].mxu1 }
 0x13b   : > { %459 = vst [vmem:[%s1168_s24 + $0x20] sm:$0xff] %v396_v51  ;;  %467 = vst [vmem:[%s1168_s24 + $0x60] sm:$0xff] %v436_v52 }
 0x13d   : > { %v698_v53 = vpop.f32.mrb[6].mxu0  ;;  %v710_v54 = vpop.f32.mrb[6].mxu1 }
 0x13e   : > { %462 = vst [vmem:[%s1168_s24 + $0x38] sm:$0xff] %v698_v53  ;;  %470 = vst [vmem:[%s1168_s24 + $0x78] sm:$0xff] %v710_v54  ;;  %v406_v55 = vpop.f32.mrb[7].mxu0  ;;  %v446_v56 = vpop.f32.mrb[7].mxu1 }
 0x13f   : > { %461 = vst [vmem:[%s1168_s24 + $0x30] sm:$0xff] %v406_v55  ;;  %469 = vst [vmem:[%s1168_s24 + $0x70] sm:$0xff] %v446_v56 }
 0x140   : > { %862 = shalt.err (!%p859_p7)
}
 0x141   : > { %s863_s8 = scalar_lea.hbm %s1188_s30, 2048  ;;  %s867_s21 = scalar_lea.hbm %s1252_s2, 8192 }
 0x142   : > { %p864_p9 = scmp.ne.s32.totalorder %s1188_s30, %s863_s8  ;;  %p868_p12 = scmp.lt.u32.totalorder %s1188_s30, %s1252_s2 }
 0x143   : > { %p869_p13 = scmp.lt.u32.totalorder %s867_s21, %s863_s8  ;;  %p871_p1 = scmp.lt.u32.totalorder %s863_s8, %s1188_s30 }
 0x144   : > { %p865_p10 = pnand %p864_p9, %p1015_p3 }
 0x145   : > { %p870_p0 = por %p869_p13, %p868_p12 }
 0x146   : > { %p866_p11 = pneg %p865_p10 }
 0x147   : > { %p872_p2 = por %p871_p1, %p870_p0 }
 0x149   : > { %p873_p4 = pnand %p872_p2, %p866_p11 }
 0x14b   : > { %876 = shalt.err (!%p873_p4)
}
 0x14c   : > { %s946_s26 = smov 128   ;;  %s947_s28 = smov 256  }
 0x14d   : > { %s948_s12 = smov 8  }
 0x14e   : > { %775 = dma.vmem_to_hbm [thread:$0]  (%p1015_p3), %s1190_s13, 2048, %s1188_s30, %s1198_s3, %s946_s26, %s947_s28, %s948_s12  }
 0x14f PF: > { %p781_p5 = scmp.ge.s32.totalorder %s943_s16, 2  ;;  %s502_s29 = sand.u32 1, %s915_s9  }
 0x150   : > { %s503_s4 = scalar_lea.sflag [#allocation3], %s502_s29 }
 0x151   : > { %p778_p6 = pnand %p781_p5, %p1024_p8 }
 0x153   : > { %910 = dma.done.wait (!%p778_p6), %s503_s4, 2048  }
 0x154   : > { %912 = vsyncadd (!%p778_p6), %s503_s4, 4294965248  ;;  %s15_s16 = sadd.s32 1, %s943_s16   ;;  %s1257_s9 = smov %s919_s10 }
 0x155   : > { %p12_p7 = scmp.ge.s32.totalorder %s15_s16, 6   ;;  %s1258_s10 = smov %s923_s11 }
 0x156   : > { %s1259_s11 = smov %s1033_s27  ;;  %s1260_s12 = smov %s935_s14 }
 0x157   : > { %s1261_s13 = smov %s939_s15  ;;  %s1262_s14 = smov %s1265_s19 }
 0x158   : > { %s1263_s15 = smov %s1269_s20  ;;  %14 = sbr.rel (!%p12_p7) target bundleno = 5 (0x5), region = 66 }
 0x15f   :  { %508 = vsyncpa [#allocation3], 1 }
 0x160   :  { %510 = vsyncpa [#allocation3 + $0x1], 1 }

</bundles_post_ra>
